<compile_context>
chip_gen: v5e
topology: v5e:2x2
jax: 0.10.0
libtpu: 0.0.40
codegen_flags: <defaults>
</compile_context>

<pallas_src>
import jax
import jax.numpy as jnp
from jax.experimental import pallas as pl
from jax.experimental.pallas import tpu as pltpu


def mlp_kernel(x_ref, w1_ref, b1_ref, w2_ref, b2_ref, o_ref, acc_ref):
    j = pl.program_id(1)

    @pl.when(j == 0)
    def _():
        acc_ref[...] = jnp.zeros_like(acc_ref)

    # Partial first linear over this hidden tile: (tm, dim_p) @ (dim_p, th) -> f32 (tm, th).
    h = jnp.dot(x_ref[...], w1_ref[...], preferred_element_type=jnp.float32)
    h = h + b1_ref[...]                      # (1, th) row broadcast, f32 VPU add
    h = h * jax.nn.sigmoid(h)                # Swish / SiLU in f32 (sigmoid on EUP)
    # Dropout is identity at inference time.
    # TODO(synk): training-mode dropout (random mask via pltpu PRNG) intentionally omitted.

    # Partial second linear: accumulate (tm, th) @ (th, dim_p) into the f32 accumulator.
    acc_ref[...] += jnp.dot(h.astype(w2_ref.dtype), w2_ref[...],
                            preferred_element_type=jnp.float32)

    @pl.when(j == pl.num_programs(1) - 1)
    def _():
        o_ref[...] = (acc_ref[...] + b2_ref[...]).astype(o_ref.dtype)


def _round_up(x, m):
    return ((x + m - 1) // m) * m


def _pick_tile(target, total, unit):
    """Largest multiple of `unit` <= min(target, total) that divides `total` (total % unit == 0)."""
    t = max(unit, (min(target, total) // unit) * unit)
    while total % t != 0:
        t -= unit
    return t


def mlp_pallas(x, w1, b1, w2, b2, *, tile_m=256, tile_h=512, compute_dtype=jnp.bfloat16):
    """x: (B, S, dim); w1: (dim, hidden); b1: (1, hidden); w2: (hidden, dim); b2: (1, dim)."""
    B, S, dim = x.shape
    hidden = w1.shape[1]
    out_dtype = x.dtype
    M = B * S

    # Pad features to lane-dense multiples of 128; clamp/round the token tile to a multiple of 8.
    dim_p = _round_up(dim, 128)
    hidden_p = _round_up(hidden, 128)
    tile_h = _pick_tile(tile_h, hidden_p, 128)
    tile_m = max(8, (min(tile_m, _round_up(M, 8)) // 8) * 8)
    M_p = _round_up(M, tile_m)

    cdt = jnp.dtype(compute_dtype)
    odt = jnp.dtype(out_dtype)
    x2d = jnp.pad(x.reshape(M, dim).astype(compute_dtype),
                  ((0, M_p - M), (0, dim_p - dim)))
    w1_p = jnp.pad(w1.astype(compute_dtype), ((0, dim_p - dim), (0, hidden_p - hidden)))
    b1_p = jnp.pad(b1.astype(jnp.float32), ((0, 0), (0, hidden_p - hidden)))
    w2_p = jnp.pad(w2.astype(compute_dtype), ((0, hidden_p - hidden), (0, dim_p - dim)))
    b2_p = jnp.pad(b2.astype(jnp.float32), ((0, 0), (0, dim_p - dim)))

    grid = (M_p // tile_m, hidden_p // tile_h)

    # VMEM budget: double-buffered x/out/weight/bias tiles + resident f32 accumulator + h temp.
    est = (2 * (tile_m * dim_p * cdt.itemsize          # x tile
                + tile_m * dim_p * odt.itemsize        # out tile
                + dim_p * tile_h * cdt.itemsize        # W1 tile
                + tile_h * dim_p * cdt.itemsize        # W2 tile
                + (tile_h + dim_p) * 4)                # bias tiles
           + tile_m * dim_p * 4                        # f32 accumulator
           + 2 * tile_m * tile_h * 4)                  # f32 hidden intermediate
    vmem_bytes = int(min(max(int(est * 1.5), 32 * 2 ** 20), 64 * 2 ** 20))

    cost = pl.CostEstimate(
        flops=4 * M_p * dim_p * hidden_p,              # two matmuls
        transcendentals=M_p * hidden_p,                # sigmoid
        bytes_accessed=(x2d.size * cdt.itemsize
                        + w1_p.size * cdt.itemsize + w2_p.size * cdt.itemsize
                        + b1_p.size * 4 + b2_p.size * 4
                        + M_p * dim_p * odt.itemsize))

    out2d = pl.pallas_call(
        mlp_kernel,
        out_shape=jax.ShapeDtypeStruct((M_p, dim_p), out_dtype),
        grid_spec=pltpu.PrefetchScalarGridSpec(
            num_scalar_prefetch=0,
            grid=grid,
            in_specs=[
                pl.BlockSpec((tile_m, dim_p), lambda i, j: (i, 0)),   # x tile
                pl.BlockSpec((dim_p, tile_h), lambda i, j: (0, j)),   # W1 hidden tile
                pl.BlockSpec((1, tile_h), lambda i, j: (0, j)),       # b1 hidden tile
                pl.BlockSpec((tile_h, dim_p), lambda i, j: (j, 0)),   # W2 hidden tile
                pl.BlockSpec((1, dim_p), lambda i, j: (0, 0)),        # b2 (revisited)
            ],
            out_specs=pl.BlockSpec((tile_m, dim_p), lambda i, j: (i, 0)),
            scratch_shapes=[pltpu.VMEM((tile_m, dim_p), jnp.float32)],
        ),
        compiler_params=pltpu.CompilerParams(
            dimension_semantics=("parallel", "arbitrary"),
            vmem_limit_bytes=vmem_bytes),
        cost_estimate=cost,
    )(x2d, w1_p, b1_p, w2_p, b2_p)

    return out2d[:M, :dim].reshape(B, S, dim)


def init_params(key, dim, hidden_dim, dtype=jnp.float32):
    """Deterministic PyTorch-style uniform(-1/sqrt(fan_in), 1/sqrt(fan_in)) init."""
    k1, k2, k3, k4 = jax.random.split(key, 4)
    bound1 = 1.0 / (dim ** 0.5)
    bound2 = 1.0 / (hidden_dim ** 0.5)
    # Stored as (in, out) so the kernel does x @ W + b (== x @ W_pt.T + b).
    w1 = jax.random.uniform(k1, (dim, hidden_dim), dtype, -bound1, bound1)
    b1 = jax.random.uniform(k2, (1, hidden_dim), dtype, -bound1, bound1)
    w2 = jax.random.uniform(k3, (hidden_dim, dim), dtype, -bound2, bound2)
    b2 = jax.random.uniform(k4, (1, dim), dtype, -bound2, bound2)
    return w1, b1, w2, b2


def mlp_ref(x, w1, b1, w2, b2):
    h = x @ w1 + b1[0]
    h = h * jax.nn.sigmoid(h)
    return h @ w2 + b2[0]


if __name__ == "__main__":
    key = jax.random.PRNGKey(0)
    kx, kp = jax.random.split(key)

    B, S, dim, hidden_dim = 2, 8, 32, 64
    x = jax.random.normal(kx, (B, S, dim), dtype=jnp.float32)
    w1, b1, w2, b2 = init_params(kp, dim, hidden_dim)

    ref = mlp_ref(x, w1, b1, w2, b2)

    # f32 MXU-operand path: must match the f32 reference tightly.
    out_f32 = jax.block_until_ready(
        mlp_pallas(x, w1, b1, w2, b2, compute_dtype=jnp.float32))
    assert out_f32.shape == (B, S, dim)
    assert jnp.allclose(out_f32, ref, atol=1e-5, rtol=1e-5), "f32 mismatch vs reference"

    # Default fast path: bf16 MXU operands, f32 accumulation (small expected deviation).
    out_bf16 = jax.block_until_ready(mlp_pallas(x, w1, b1, w2, b2))
    assert out_bf16.shape == (B, S, dim)
    assert jnp.allclose(out_bf16, ref, atol=2e-2, rtol=2e-2), "bf16 mismatch vs reference"

    print("KERNEL_OK")
</pallas_src>

<mosaic_0001>
module attributes {stable_mosaic.version = 11 : i64} {
  func.func @mlp_kernel(%arg0: i32, %arg1: i32, %arg2: memref<16x128xf32, #tpu.memory_space<vmem>>, %arg3: memref<128x128xf32, #tpu.memory_space<vmem>>, %arg4: memref<1x128xf32, #tpu.memory_space<vmem>>, %arg5: memref<128x128xf32, #tpu.memory_space<vmem>>, %arg6: memref<1x128xf32, #tpu.memory_space<vmem>>, %arg7: memref<16x128xf32, #tpu.memory_space<vmem>>, %arg8: memref<16x128xf32, #tpu.memory_space<vmem>>) attributes {dimension_semantics = [#tpu.dimension_semantics<parallel>, #tpu.dimension_semantics<arbitrary>], iteration_bounds = array<i64: 1, 1>, scalar_prefetch = 0 : i64, scratch_operands = 1 : i64, tpu.core_type = #tpu.core_type<tc>, window_params = [{transform_indices = @transform_0, window_bounds = array<i64: 16, 128>}, {transform_indices = @transform_1, window_bounds = array<i64: 128, 128>}, {transform_indices = @transform_2, window_bounds = array<i64: 1, 128>}, {transform_indices = @transform_3, window_bounds = array<i64: 128, 128>}, {pipeline_mode = #tpu.pipeline_mode<synchronous>, transform_indices = @transform_4, window_bounds = array<i64: 1, 128>}, {transform_indices = @transform_5, window_bounds = array<i64: 16, 128>}]} {
    %c0_i32 = arith.constant 0 : i32
    %0 = arith.cmpi eq, %arg1, %c0_i32 : i32
    %1 = arith.extui %0 : i1 to i32
    %c0_i32_0 = arith.constant 0 : i32
    %2 = arith.cmpi ne, %1, %c0_i32_0 : i32
    scf.if %2 {
      %cst_16 = arith.constant 0.000000e+00 : f32
      %23 = vector.broadcast %cst_16 : f32 to vector<16x128xf32>
      %c0_17 = arith.constant 0 : index
      %c0_18 = arith.constant 0 : index
      %24 = vector.load %arg8[%c0_17, %c0_18] : memref<16x128xf32, #tpu.memory_space<vmem>>, vector<16x128xf32>
      tpu.vector_store %arg8[%c0_17, %c0_18], %23 {strides = array<i32>} : memref<16x128xf32, #tpu.memory_space<vmem>>, vector<16x128xf32>,
    } else {
    }
    %c0 = arith.constant 0 : index
    %c0_1 = arith.constant 0 : index
    %3 = vector.load %arg2[%c0, %c0_1] : memref<16x128xf32, #tpu.memory_space<vmem>>, vector<16x128xf32>
    %c0_2 = arith.constant 0 : index
    %c0_3 = arith.constant 0 : index
    %4 = vector.load %arg3[%c0_2, %c0_3] : memref<128x128xf32, #tpu.memory_space<vmem>>, vector<128x128xf32>
    %cst = arith.constant dense<0.000000e+00> : vector<16x128xf32>
    %5 = tpu.matmul %3, %4, %cst {dimension_numbers = #tpu.dot_dimension_numbers<[1], [0], [0], [1], [0, 0, 1, 1], [], []>} : vector<16x128xf32>, vector<128x128xf32>, vector<16x128xf32> -> vector<16x128xf32>
    %c0_4 = arith.constant 0 : index
    %c0_5 = arith.constant 0 : index
    %6 = vector.load %arg4[%c0_4, %c0_5] : memref<1x128xf32, #tpu.memory_space<vmem>>, vector<1x128xf32>
    %7 = vector.broadcast %6 : vector<1x128xf32> to vector<16x128xf32>
    %8 = arith.addf %5, %7 : vector<16x128xf32>
    %9 = arith.negf %8 : vector<16x128xf32>
    %10 = math.exp %9 : vector<16x128xf32>
    %cst_6 = arith.constant 1.000000e+00 : f32
    %11 = vector.broadcast %cst_6 : f32 to vector<16x128xf32>
    %12 = arith.addf %11, %10 : vector<16x128xf32>
    %13 = arith.divf %11, %12 : vector<16x128xf32>
    %14 = arith.mulf %8, %13 : vector<16x128xf32>
    %c0_7 = arith.constant 0 : index
    %c0_8 = arith.constant 0 : index
    %15 = vector.load %arg8[%c0_7, %c0_8] : memref<16x128xf32, #tpu.memory_space<vmem>>, vector<16x128xf32>
    %c0_9 = arith.constant 0 : index
    %c0_10 = arith.constant 0 : index
    %16 = vector.load %arg5[%c0_9, %c0_10] : memref<128x128xf32, #tpu.memory_space<vmem>>, vector<128x128xf32>
    %cst_11 = arith.constant dense<0.000000e+00> : vector<16x128xf32>
    %17 = tpu.matmul %14, %16, %cst_11 {dimension_numbers = #tpu.dot_dimension_numbers<[1], [0], [0], [1], [0, 0, 1, 1], [], []>} : vector<16x128xf32>, vector<128x128xf32>, vector<16x128xf32> -> vector<16x128xf32>
    %18 = arith.addf %15, %17 : vector<16x128xf32>
    %c0_12 = arith.constant 0 : index
    %c0_13 = arith.constant 0 : index
    %19 = vector.load %arg8[%c0_12, %c0_13] : memref<16x128xf32, #tpu.memory_space<vmem>>, vector<16x128xf32>
    tpu.vector_store %arg8[%c0_12, %c0_13], %18 {strides = array<i32>} : memref<16x128xf32, #tpu.memory_space<vmem>>, vector<16x128xf32>,
    %c0_i32_14 = arith.constant 0 : i32
    %20 = arith.cmpi eq, %arg1, %c0_i32_14 : i32
    %21 = arith.extui %20 : i1 to i32
    %c0_i32_15 = arith.constant 0 : i32
    %22 = arith.cmpi ne, %21, %c0_i32_15 : i32
    scf.if %22 {
      %c0_16 = arith.constant 0 : index
      %c0_17 = arith.constant 0 : index
      %23 = vector.load %arg8[%c0_16, %c0_17] : memref<16x128xf32, #tpu.memory_space<vmem>>, vector<16x128xf32>
      %c0_18 = arith.constant 0 : index
      %c0_19 = arith.constant 0 : index
      %24 = vector.load %arg6[%c0_18, %c0_19] : memref<1x128xf32, #tpu.memory_space<vmem>>, vector<1x128xf32>
      %25 = vector.broadcast %24 : vector<1x128xf32> to vector<16x128xf32>
      %26 = arith.addf %23, %25 : vector<16x128xf32>
      %c0_20 = arith.constant 0 : index
      %c0_21 = arith.constant 0 : index
      %27 = vector.load %arg7[%c0_20, %c0_21] : memref<16x128xf32, #tpu.memory_space<vmem>>, vector<16x128xf32>
      tpu.vector_store %arg7[%c0_20, %c0_21], %26 {strides = array<i32>} : memref<16x128xf32, #tpu.memory_space<vmem>>, vector<16x128xf32>,
    } else {
    }
    return
  }
  func.func @transform_0(%arg0: i32, %arg1: i32) -> (i32, i32) {
    %c0_i32 = arith.constant 0 : i32
    %c0_i32_0 = arith.constant 0 : i32
    return %arg0, %c0_i32 : i32, i32
  }
  func.func @transform_1(%arg0: i32, %arg1: i32) -> (i32, i32) {
    %c0_i32 = arith.constant 0 : i32
    %c0_i32_0 = arith.constant 0 : i32
    return %c0_i32, %arg1 : i32, i32
  }
  func.func @transform_2(%arg0: i32, %arg1: i32) -> (i32, i32) {
    %c0_i32 = arith.constant 0 : i32
    %c0_i32_0 = arith.constant 0 : i32
    return %c0_i32, %arg1 : i32, i32
  }
  func.func @transform_3(%arg0: i32, %arg1: i32) -> (i32, i32) {
    %c0_i32 = arith.constant 0 : i32
    %c0_i32_0 = arith.constant 0 : i32
    return %arg1, %c0_i32 : i32, i32
  }
  func.func @transform_4(%arg0: i32, %arg1: i32) -> (i32, i32) {
    %c0_i32 = arith.constant 0 : i32
    %c0_i32_0 = arith.constant 0 : i32
    %c0_i32_1 = arith.constant 0 : i32
    return %c0_i32, %c0_i32_0 : i32, i32
  }
  func.func @transform_5(%arg0: i32, %arg1: i32) -> (i32, i32) {
    %c0_i32 = arith.constant 0 : i32
    %c0_i32_0 = arith.constant 0 : i32
    return %arg0, %c0_i32 : i32, i32
  }
}

</mosaic_0001>

<bundles_post_ra>
// kernel: tpu_custom_call.1
= control target key start
LH: loop header
LB: loop body
LE: loop exit
PB: predicated region body
PF: predicated region fallthrough
CT: control target
= control target key end

     0   :  { %10 = vsyncpa [#allocation4], 0  ;;  %s455_s0 = inlined_call_operand.hbm [shape: f32[16,128], index: 0, kind: input, shape index: {}]   ;;  %s456_s1 = inlined_call_operand.hbm [shape: f32[128,128], index: 1, kind: input, shape index: {}]   ;;  %s457_s2 = inlined_call_operand.vmem [shape: f32[1,128], index: 2, kind: input, shape index: {}]   ;;  %s458_s3 = inlined_call_operand.hbm [shape: f32[128,128], index: 3, kind: input, shape index: {}]   ;;  %s459_s4 = inlined_call_operand.vmem [shape: f32[1,128], index: 4, kind: input, shape index: {}]   ;;  %s460_s5 = inlined_call_operand.hbm [shape: f32[16,128], index: 5, kind: output, shape index: {}]  }
   0x1   :  { %11 = vsyncpa [#allocation7], 0 }
   0x2   :  { %12 = vsyncpa [#allocation5], 0  ;;  %s30_s20 = sshll.u32 %s456_s1, 4  ;;  %s389_s21 = smov [#allocation6]   ;;  %s31_s20 = int_to_ptr.hbm [resolvable:$true] %s30_s20 }
   0x3   :  { %s32_s22 = sshll.u32 %s389_s21, 4  ;;  %s17_s25 = sshll.u32 %s455_s0, 4  ;;  %s33_s22 = int_to_ptr.vmem [resolvable:$true] %s32_s22  ;;  %s18_s25 = int_to_ptr.hbm [resolvable:$true] %s17_s25 }
   0x4   :  { %s390_s26 = smov 128   ;;  %s391_s27 = smov 8  }
   0x5   :  { %38 = dma.hbm_to_vmem [thread:$0]  %s31_s20, 2048, %s33_s22, [#allocation7], %s390_s26, %s390_s26, %s391_s27  }
   0x6   :  { %s392_s28 = smov [#allocation3]   ;;  %s45_s1 = sshll.u32 %s458_s3, 4  ;;  %s46_s1 = int_to_ptr.hbm [resolvable:$true] %s45_s1 }
   0x7   :  { %s19_s29 = sshll.u32 %s392_s28, 4  ;;  %s393_s0 = smov [#allocation8]   ;;  %s20_s29 = int_to_ptr.vmem [resolvable:$true] %s19_s29 }
   0x8   :  { %25 = dma.hbm_to_vmem [thread:$0]  %s18_s25, 256, %s20_s29, [#allocation4], %s390_s26, %s390_s26, %s391_s27  }
   0x9   :  { %s47_s7 = sshll.u32 %s393_s0, 4  ;;  %s48_s7 = int_to_ptr.vmem [resolvable:$true] %s47_s7 }
   0xa   :  { %53 = dma.hbm_to_vmem [thread:$0]  %s46_s1, 2048, %s48_s7, [#allocation7], %s390_s26, %s390_s26, %s391_s27  }
   0xb   :  { %383 = dma.done.wait [#allocation4], 256  }
   0xc   :  { %384 = vsyncadd [#allocation4], 4294967040 }
   0xd   :  { %385 = dma.done.wait [#allocation7], 4096  }
   0xe   :  { %386 = vsyncadd [#allocation7], 4294963200  ;;  %v91_v0 = vld [vmem:[#allocation6 + $0x78] sm:$0xff]  ;;  %v90_v1 = vld [vmem:[#allocation6 + $0x70] sm:$0xff]  ;;  %s394_s10 = smov [#allocation9]   ;;  %s223_s14 = sshll.u32 %s460_s5, 4  ;;  %s224_s14 = int_to_ptr.hbm [resolvable:$true] %s223_s14 }
   0xf   :  { %96 = vmatpush.msra.mxu0 %v91_v0  ;;  %239 = vmatpush.msra.mxu2 %v91_v0  ;;  %v89_v2 = vld [vmem:[#allocation6 + $0x68] sm:$0xff]  ;;  %v88_v3 = vld [vmem:[#allocation6 + $0x60] sm:$0xff]  ;;  %v87_v4 = vld [vmem:[#allocation6 + $0x58] sm:$0xff]  ;;  %s221_s11 = sshll.u32 %s394_s10, 4  ;;  %s222_s11 = int_to_ptr.vmem [resolvable:$true] %s221_s11 }
  0x10   :  { %v86_v5 = vld [vmem:[#allocation6 + $0x50] sm:$0xff]  ;;  %v85_v6 = vld [vmem:[#allocation6 + $0x48] sm:$0xff]  ;;  %v84_v7 = vld [vmem:[#allocation6 + $0x40] sm:$0xff] }
  0x11   :  { %97 = vmatpush.msra.mxu0 %v90_v1  ;;  %240 = vmatpush.msra.mxu2 %v90_v1  ;;  %v83_v8 = vld [vmem:[#allocation6 + $0x38] sm:$0xff]  ;;  %v82_v9 = vld [vmem:[#allocation6 + $0x30] sm:$0xff]  ;;  %v81_v10 = vld [vmem:[#allocation6 + $0x28] sm:$0xff] }
  0x12   :  { %v80_v11 = vld [vmem:[#allocation6 + $0x20] sm:$0xff]  ;;  %v79_v12 = vld [vmem:[#allocation6 + $0x18] sm:$0xff]  ;;  %v78_v13 = vld [vmem:[#allocation6 + $0x10] sm:$0xff] }
  0x13   :  { %98 = vmatpush.msra.mxu0 %v89_v2  ;;  %241 = vmatpush.msra.mxu2 %v89_v2  ;;  %v77_v14 = vld [vmem:[#allocation6 + $0x8] sm:$0xff]  ;;  %v76_v15 = vld [vmem:[#allocation6] sm:$0xff]  ;;  %v74_v16 = vld [vmem:[#allocation3] sm:$0xff] }
  0x14   :  { %v75_v17 = vld [vmem:[#allocation3 + $0x8] sm:$0xff]  ;;  %v175_v19 = vld [vmem:[#allocation8 + $0x70] sm:$0xff]  ;;  %v174_v20 = vld [vmem:[#allocation8 + $0x68] sm:$0xff] }
  0x15   :  { %99 = vmatpush.msra.mxu0 %v88_v3  ;;  %242 = vmatpush.msra.mxu2 %v88_v3  ;;  %v176_v18 = vld [vmem:[#allocation8 + $0x78] sm:$0xff]  ;;  %v173_v21 = vld [vmem:[#allocation8 + $0x60] sm:$0xff]  ;;  %v171_v23 = vld [vmem:[#allocation8 + $0x50] sm:$0xff] }
  0x16   :  { %177 = vmatpush.msra.mxu1 %v176_v18  ;;  %255 = vmatpush.msra.mxu3 %v176_v18  ;;  %v172_v22 = vld [vmem:[#allocation8 + $0x58] sm:$0xff]  ;;  %v170_v24 = vld [vmem:[#allocation8 + $0x48] sm:$0xff]  ;;  %v169_v25 = vld [vmem:[#allocation8 + $0x40] sm:$0xff] }
  0x17   :  { %100 = vmatpush.msra.mxu0 %v87_v4  ;;  %243 = vmatpush.msra.mxu2 %v87_v4  ;;  %v168_v26 = vld [vmem:[#allocation8 + $0x38] sm:$0xff]  ;;  %v167_v27 = vld [vmem:[#allocation8 + $0x30] sm:$0xff]  ;;  %v166_v28 = vld [vmem:[#allocation8 + $0x28] sm:$0xff] }
  0x18   :  { %178 = vmatpush.msra.mxu1 %v175_v19  ;;  %256 = vmatpush.msra.mxu3 %v175_v19  ;;  %v165_v29 = vld [vmem:[#allocation8 + $0x20] sm:$0xff]  ;;  %v164_v30 = vld [vmem:[#allocation8 + $0x18] sm:$0xff]  ;;  %v163_v31 = vld [vmem:[#allocation8 + $0x10] sm:$0xff] }
  0x19   :  { %101 = vmatpush.msra.mxu0 %v86_v5  ;;  %244 = vmatpush.msra.mxu2 %v86_v5  ;;  %v162_v32 = vld [vmem:[#allocation8 + $0x8] sm:$0xff]  ;;  %v277_v33 = vld [vmem:[%s457_s2] ss:$0 sm:$0xff]  ;;  %v161_v34 = vld [vmem:[#allocation8] sm:$0xff] }
  0x1a   :  { %179 = vmatpush.msra.mxu1 %v174_v20  ;;  %257 = vmatpush.msra.mxu3 %v174_v20  ;;  %v278_v3 = vld [vmem:[%s459_s4] ss:$0 sm:$0xff] }
  0x1b   :  { %102 = vmatpush.msra.mxu0 %v85_v6  ;;  %245 = vmatpush.msra.mxu2 %v85_v6 }
  0x1c   :  { %180 = vmatpush.msra.mxu1 %v173_v21  ;;  %258 = vmatpush.msra.mxu3 %v173_v21 }
  0x1d   :  { %103 = vmatpush.msra.mxu0 %v84_v7  ;;  %246 = vmatpush.msra.mxu2 %v84_v7 }
  0x1e   :  { %181 = vmatpush.msra.mxu1 %v172_v22  ;;  %259 = vmatpush.msra.mxu3 %v172_v22 }
  0x1f   :  { %104 = vmatpush.msra.mxu0 %v83_v8  ;;  %247 = vmatpush.msra.mxu2 %v83_v8 }
  0x20   :  { %182 = vmatpush.msra.mxu1 %v171_v23  ;;  %260 = vmatpush.msra.mxu3 %v171_v23 }
  0x21   :  { %105 = vmatpush.msra.mxu0 %v82_v9  ;;  %248 = vmatpush.msra.mxu2 %v82_v9 }
  0x22   :  { %183 = vmatpush.msra.mxu1 %v170_v24  ;;  %261 = vmatpush.msra.mxu3 %v170_v24 }
  0x23   :  { %106 = vmatpush.msra.mxu0 %v81_v10  ;;  %249 = vmatpush.msra.mxu2 %v81_v10 }
  0x24   :  { %184 = vmatpush.msra.mxu1 %v169_v25  ;;  %262 = vmatpush.msra.mxu3 %v169_v25 }
  0x25   :  { %107 = vmatpush.msra.mxu0 %v80_v11  ;;  %250 = vmatpush.msra.mxu2 %v80_v11 }
  0x26   :  { %185 = vmatpush.msra.mxu1 %v168_v26  ;;  %263 = vmatpush.msra.mxu3 %v168_v26 }
  0x27   :  { %108 = vmatpush.msra.mxu0 %v79_v12  ;;  %251 = vmatpush.msra.mxu2 %v79_v12 }
  0x28   :  { %186 = vmatpush.msra.mxu1 %v167_v27  ;;  %264 = vmatpush.msra.mxu3 %v167_v27 }
  0x29   :  { %109 = vmatpush.msra.mxu0 %v78_v13  ;;  %252 = vmatpush.msra.mxu2 %v78_v13 }
  0x2a   :  { %187 = vmatpush.msra.mxu1 %v166_v28  ;;  %265 = vmatpush.msra.mxu3 %v166_v28 }
  0x2b   :  { %110 = vmatpush.msra.mxu0 %v77_v14  ;;  %253 = vmatpush.msra.mxu2 %v77_v14 }
  0x2c   :  { %188 = vmatpush.msra.mxu1 %v165_v29  ;;  %266 = vmatpush.msra.mxu3 %v165_v29 }
  0x2d   :  { %111 = vmatpush.msra.mxu0 %v76_v15  ;;  %254 = vmatpush.msra.mxu2 %v76_v15 }
  0x2e   :  { %112 = vmatmul.f32.vlgmr.msra.gmra.mxu0 %v74_v16  ;;  %115 = vmatmul.f32.vlgmr.msra.gmra.mxu2 %v75_v17 }
  0x2f   :  { %189 = vmatpush.msra.mxu1 %v164_v30  ;;  %267 = vmatpush.msra.mxu3 %v164_v30 }
  0x31   :  { %190 = vmatpush.msra.mxu1 %v163_v31  ;;  %268 = vmatpush.msra.mxu3 %v163_v31 }
  0x33   :  { %191 = vmatpush.msra.mxu1 %v162_v32  ;;  %269 = vmatpush.msra.mxu3 %v162_v32 }
  0x35   :  { %192 = vmatpush.msra.mxu1 %v161_v34  ;;  %270 = vmatpush.msra.mxu3 %v161_v34 }
  0xab   :  { %v113_v35 = vpop.f32.mrf.mxu0 }
  0xac   :  { %v114_v36 = vadd.f32 %v277_v33, %v113_v35 }
  0xae   :  { %v237_v37 = vmul.f32 -1.442695, %v114_v36 }
  0xb0   :  { %279 = vpow2.f32 %v237_v37 }
  0xb1   :  { %v116_v38 = vpop.f32.mrf.mxu2 }
  0xb2   :  { %v117_v39 = vadd.f32 %v277_v33, %v116_v38 }
  0xb4   :  { %v238_v40 = vmul.f32 -1.442695, %v117_v39 }
  0xb6   :  { %v280_v41 = vpop.eup %279  ;;  %281 = vpow2.f32 %v238_v40 }
  0xb7   :  { %v125_v42 = vadd.f32 1.0, %v280_v41 }
  0xb9   :  { %283 = vrcp.f32 %v125_v42  ;;  %v138_v47 = vand.u32 2147483648, %v125_v42  ;;  %vm132_vm0 = vweird.f32 %v125_v42  ;;  %v136_v49 = vand.u32 2147483647, %v125_v42 }
  0xbb   :  { %v139_v52 = vor.u32 1.1754944e-38, %v138_v47  ;;  %vm137_vm3 = vcmp.eq.f32.partialorder %v136_v49, 8.507059e+37 }
  0xbc   :  { %v282_v43 = vpop.eup %281 }
  0xbd   :  { %v126_v44 = vadd.f32 1.0, %v282_v43 }
  0xbf   :  { %v284_v45 = vpop.eup %283  ;;  %285 = vrcp.f32 %v126_v44  ;;  %v153_v58 = vand.u32 2147483648, %v126_v44  ;;  %v151_v61 = vand.u32 2147483647, %v126_v44  ;;  %vm147_vm5 = vweird.f32 %v126_v44 }
  0xc0   :  { %v128_v46 = vmul.f32 %v284_v45, %v125_v42  ;;  %vm133_vm1 = vweird.f32 %v284_v45 }
  0xc1   :  { %vm134_vm2 = vmor %vm132_vm0, %vm133_vm1  ;;  %v154_v63 = vor.u32 1.1754944e-38, %v153_v58  ;;  %vm152_vm7 = vcmp.eq.f32.partialorder %v151_v61, 8.507059e+37 }
  0xc2   :  { %v129_v48 = vsub.f32 1.0, %v128_v46 }
  0xc4   :  { %v130_v50 = vmul.f32 %v284_v45, %v129_v48 }
  0xc5   :  { %v286_v51 = vpop.eup %285 }
  0xc6   :  { %v131_v53 = vadd.f32 %v284_v45, %v130_v50  ;;  %v143_v54 = vmul.f32 %v286_v51, %v126_v44  ;;  %vm148_vm4 = vweird.f32 %v286_v51 }
  0xc7   :  { %vm149_vm6 = vmor %vm147_vm5, %vm148_vm4 }
  0xc8   :  { %v135_v55 = vsel %vm134_vm2, %v284_v45, %v131_v53  ;;  %v144_v56 = vsub.f32 1.0, %v143_v54 }
  0xc9   :  { %v140_v57 = vsel %vm137_vm3, %v139_v52, %v135_v55 }
  0xca   :  { %v157_v59 = vmul.f32 %v140_v57, %v114_v36  ;;  %v145_v60 = vmul.f32 %v286_v51, %v144_v56 }
  0xcc   :  { %193 = vmatmul.f32.vlgmr.msra.gmra.mxu1 %v157_v59  ;;  %v146_v62 = vadd.f32 %v286_v51, %v145_v60 }
  0xce   :  { %v150_v0 = vsel %vm149_vm6, %v286_v51, %v146_v62 }
  0xcf   :  { %v155_v1 = vsel %vm152_vm7, %v154_v63, %v150_v0 }
  0xd0   :  { %v158_v2 = vmul.f32 %v155_v1, %v117_v39 }
  0xd2   :  { %196 = vmatmul.f32.vlgmr.msra.gmra.mxu3 %v158_v2 }
 0x149   :  { %v194_v4 = vpop.f32.mrf.mxu1 }
 0x14a   :  { %v213_v5 = vadd.f32 %v278_v3, %v194_v4 }
 0x14c   :  { %215 = vst [vmem:[#allocation9] sm:$0xff] %v213_v5 }
 0x155   :  { %v197_v6 = vpop.f32.mrf.mxu3 }
 0x156   :  { %v214_v7 = vadd.f32 %v278_v3, %v197_v6 }
 0x158   :  { %216 = vst [vmem:[#allocation9 + $0x8] sm:$0xff] %v214_v7 }
 0x159   :  { %229 = dma.vmem_to_hbm [thread:$0]  %s222_s11, 256, %s224_s14, [#allocation5], %s390_s26, %s390_s26, %s391_s27  }
 0x15a   :  { %387 = dma.done.wait [#allocation5], 256  }
 0x15b   :  { %388 = vsyncadd [#allocation5], 4294967040 }
 0x15c   :  { %234 = vsyncpa [#allocation4], 1 }
 0x15d   :  { %235 = vsyncpa [#allocation7], 1 }
 0x15e   :  { %236 = vsyncpa [#allocation5], 1 }

</bundles_post_ra>
